<compile_context>
chip_gen: v6e
topology: v6e:2x2x1
jax: 0.10.0
libtpu: 0.0.40
codegen_flags: <defaults>
</compile_context>

<pallas_src>
import functools

import jax
import jax.numpy as jnp
from jax.experimental import pallas as pl
from jax.experimental.pallas import tpu as pltpu


# Per-input-block byte cap.  2 MiB keeps in+out double-buffered blocks (~8 MiB)
# well under every generation's default scoped-VMEM limit while being large
# enough (>= 512-lane-equivalent slabs) to sit near the HBM roofline.
_CAP_BYTES = 2 * 1024 * 1024


# ----------------------------- Pallas kernel --------------------------------
def _pixelnorm_kernel(x_ref, o_ref, *, epsilon, inv_c):
    # Block layout: (BN, C, TS, 128)  or fallback (BN, C, HW).
    # The reduction axis (channels) is always axis=1.
    x = x_ref[...]
    xf = x.astype(jnp.float32)
    ss = jnp.sum(xf * xf, axis=1, keepdims=True)        # f32 accumulation
    inv = jax.lax.rsqrt(ss * inv_c + epsilon)            # EUP rsqrt, f32
    # Final scale in the input dtype (bf16 stays bf16 on the second pass).
    o_ref[...] = (x * inv.astype(x.dtype)).astype(o_ref.dtype)


# --------------------------- tile-size selection ------------------------------
def _largest_tile(S, cap):
    """Largest divisor of S that is a multiple of 8 (or S itself) and <= cap."""
    best = None
    for d in range(1, S + 1):
        if S % d:
            continue
        if d != S and d % 8 != 0:
            continue
        if d <= cap:
            best = d
    if best is not None:
        return best
    # Nothing fits under the cap (e.g. enormous C): take the smallest legal tile.
    for d in range(1, S + 1):
        if S % d == 0 and (d % 8 == 0 or d == S):
            return d
    return S


# ------------------------------ wrapper --------------------------------------
def pixel_norm(x, epsilon=1e-8):
    """x: (N, C, *spatial) -> same shape, normalized over dim 1."""
    orig_shape = x.shape
    N, C = int(orig_shape[0]), int(orig_shape[1])
    HW = 1
    for d in orig_shape[2:]:
        HW *= int(d)

    itemsize = jnp.dtype(x.dtype).itemsize
    kernel = functools.partial(
        _pixelnorm_kernel, epsilon=float(epsilon), inv_c=1.0 / float(C))
    cost = pl.CostEstimate(
        flops=3 * N * C * HW,
        transcendentals=N * HW,
        bytes_accessed=2 * N * C * HW * itemsize,
    )

    if HW % 128 == 0 and HW >= 128:
        # ---- lane-dense 4-D path: (N, C, S, 128), reduce over leading C ----
        S = HW // 128
        x4 = x.reshape(N, C, S, 128)

        row_bytes = C * 128 * itemsize                   # bytes per unit of S
        total_bytes = N * S * row_bytes
        if total_bytes <= _CAP_BYTES:
            # Whole tensor in one block: one grid step, zero step overhead.
            BN, TS = N, S
        else:
            BN = 1
            cap_s = max(1, _CAP_BYTES // row_bytes)
            TS = _largest_tile(S, cap_s)

        grid = (N // BN, S // TS)
        out = pl.pallas_call(
            kernel,
            out_shape=jax.ShapeDtypeStruct((N, C, S, 128), x.dtype),
            grid_spec=pltpu.PrefetchScalarGridSpec(
                num_scalar_prefetch=0,
                grid=grid,
                in_specs=[pl.BlockSpec((BN, C, TS, 128),
                                       lambda n, s: (n, 0, s, 0))],
                out_specs=pl.BlockSpec((BN, C, TS, 128),
                                       lambda n, s: (n, 0, s, 0)),
            ),
            compiler_params=pltpu.CompilerParams(
                dimension_semantics=("parallel", "parallel")),
            cost_estimate=cost,
        )(x4)
        return out.reshape(orig_shape)

    # ---- fallback 3-D path (HW not a multiple of 128): correctness first ----
    x3 = x.reshape(N, C, HW)
    if N * C * HW * itemsize <= _CAP_BYTES:
        BN = N
    else:
        BN = 1
    grid = (N // BN,)
    out = pl.pallas_call(
        kernel,
        out_shape=jax.ShapeDtypeStruct((N, C, HW), x.dtype),
        grid_spec=pltpu.PrefetchScalarGridSpec(
            num_scalar_prefetch=0,
            grid=grid,
            in_specs=[pl.BlockSpec((BN, C, HW), lambda n: (n, 0, 0))],
            out_specs=pl.BlockSpec((BN, C, HW), lambda n: (n, 0, 0)),
        ),
        compiler_params=pltpu.CompilerParams(
            dimension_semantics=("parallel",)),
        cost_estimate=cost,
    )(x3)
    return out.reshape(orig_shape)


class PixelNorm:
    """Pallas-backed equivalent of the PyTorch PixelNorm module."""

    def __init__(self, epsilon=1e-8):
        self.epsilon = epsilon

    def __call__(self, x):
        return pixel_norm(x, self.epsilon)


# --------------------------------- main --------------------------------------
if __name__ == "__main__":
    key = jax.random.PRNGKey(0)

    N, C, H, W = 2, 4, 16, 16
    x = jax.random.normal(key, (N, C, H, W), dtype=jnp.float32)

    norm = PixelNorm()
    y = norm(x)
    y = jax.block_until_ready(y)
    assert y.shape == (N, C, H, W)

    # Reference check (pure JAX, same math as the PyTorch module).
    y_ref = x * jax.lax.rsqrt(
        jnp.mean(x * x, axis=1, keepdims=True) + norm.epsilon)
    assert jnp.allclose(y, y_ref, atol=1e-5, rtol=1e-5)

    print("KERNEL_OK")
</pallas_src>

<mosaic_0001>
module attributes {stable_mosaic.version = 11 : i64} {
  func.func @_pixelnorm_kernel(%arg0: i32, %arg1: i32, %arg2: memref<2x4x2x128xf32, #tpu.memory_space<vmem>>, %arg3: memref<2x4x2x128xf32, #tpu.memory_space<vmem>>) attributes {dimension_semantics = [#tpu.dimension_semantics<parallel>, #tpu.dimension_semantics<parallel>], iteration_bounds = array<i64: 1, 1>, scalar_prefetch = 0 : i64, scratch_operands = 0 : i64, tpu.core_type = #tpu.core_type<tc>, window_params = [{transform_indices = @transform_0, window_bounds = array<i64: 2, 4, 2, 128>}, {transform_indices = @transform_1, window_bounds = array<i64: 2, 4, 2, 128>}]} {
    %c0 = arith.constant 0 : index
    %c0_0 = arith.constant 0 : index
    %c0_1 = arith.constant 0 : index
    %c0_2 = arith.constant 0 : index
    %0 = vector.load %arg2[%c0, %c0_0, %c0_1, %c0_2] : memref<2x4x2x128xf32, #tpu.memory_space<vmem>>, vector<2x4x2x128xf32>
    %1 = arith.mulf %0, %0 : vector<2x4x2x128xf32>
    %cst = arith.constant dense<0.000000e+00> : vector<2x2x128xf32>
    %2 = vector.multi_reduction <add>, %1, %cst [1] : vector<2x4x2x128xf32> to vector<2x2x128xf32>
    %3 = vector.shape_cast %2 : vector<2x2x128xf32> to vector<2x1x2x128xf32>
    %cst_3 = arith.constant 2.500000e-01 : f32
    %4 = vector.broadcast %cst_3 : f32 to vector<2x1x2x128xf32>
    %5 = arith.mulf %3, %4 : vector<2x1x2x128xf32>
    %cst_4 = arith.constant 9.99999993E-9 : f32
    %6 = vector.broadcast %cst_4 : f32 to vector<2x1x2x128xf32>
    %7 = arith.addf %5, %6 : vector<2x1x2x128xf32>
    %8 = math.rsqrt %7 : vector<2x1x2x128xf32>
    %9 = vector.broadcast %8 : vector<2x1x2x128xf32> to vector<2x4x2x128xf32>
    %10 = arith.mulf %0, %9 : vector<2x4x2x128xf32>
    %c0_5 = arith.constant 0 : index
    %c0_6 = arith.constant 0 : index
    %c0_7 = arith.constant 0 : index
    %c0_8 = arith.constant 0 : index
    %11 = vector.load %arg3[%c0_5, %c0_6, %c0_7, %c0_8] : memref<2x4x2x128xf32, #tpu.memory_space<vmem>>, vector<2x4x2x128xf32>
    tpu.vector_store %arg3[%c0_5, %c0_6, %c0_7, %c0_8], %10 {strides = array<i32>} : memref<2x4x2x128xf32, #tpu.memory_space<vmem>>, vector<2x4x2x128xf32>,
    return
  }
  func.func @transform_0(%arg0: i32, %arg1: i32) -> (i32, i32, i32, i32) {
    %c0_i32 = arith.constant 0 : i32
    %c0_i32_0 = arith.constant 0 : i32
    %c0_i32_1 = arith.constant 0 : i32
    return %arg0, %c0_i32, %arg1, %c0_i32_0 : i32, i32, i32, i32
  }
  func.func @transform_1(%arg0: i32, %arg1: i32) -> (i32, i32, i32, i32) {
    %c0_i32 = arith.constant 0 : i32
    %c0_i32_0 = arith.constant 0 : i32
    %c0_i32_1 = arith.constant 0 : i32
    return %arg0, %c0_i32, %arg1, %c0_i32_0 : i32, i32, i32, i32
  }
}

</mosaic_0001>

<bundles_post_ra>
// kernel: tpu_custom_call.1
= control target key start
LH: loop header
LB: loop body
LE: loop exit
PB: predicated region body
PF: predicated region fallthrough
CT: control target
= control target key end

     0   :  { %6 = vsyncpa [#allocation3], 0  ;;  %s179_s0 = inlined_call_operand.hbm [shape: f32[2,4,2,128], index: 0, kind: input, shape index: {}]   ;;  %s180_s1 = inlined_call_operand.hbm [shape: f32[2,4,2,128], index: 1, kind: output, shape index: {}]  }
   0x1   :  { %7 = vsyncpa [#allocation4], 0  ;;  %s145_s6 = smov [#allocation2]  }
   0x2   :  { %s13_s7 = sshll.u32 %s145_s6, 4  ;;  %s14_s7 = int_to_ptr.vmem [resolvable:$true] %s13_s7 }
   0x3   :  { %s109_s8 = scalar_lea.vmem %s14_s7, 256  ;;  %p114_p1 = scmp.lt.s32.totalorder %s14_s7, %s14_s7 }
   0x4   :  { %p110_p0 = scmp.ne.s32.totalorder %s14_s7, %s109_s8  ;;  %p115_p2 = scmp.lt.s32.totalorder %s109_s8, %s109_s8 }
   0x6   :  { %p116_p3 = por %p115_p2, %p114_p1 }
   0x8   :  { %p117_p4 = pnand %p116_p3, %p110_p0 }
   0xa   :  { %120 = shalt.err (!%p117_p4)
}
   0xb   :  { %s146_s9 = smov 32   ;;  %s147_s10 = smov 2  }
   0xc   :  { %19 = dma.hbm_to_vmem [thread:$0]  %s179_s0, 256, %s14_s7, [#allocation3], %s146_s9, %s146_s9, %s147_s10  }
   0xd   :  { %141 = dma.done.wait [#allocation3], 256  }
   0xe   :  { %142 = vsyncadd [#allocation3], 4294967040  ;;  %vm39_vm0 = vcmask 1041408   ;;  %v23_v0 = vld [vmem:[#allocation2] sm:$0x3]  ;;  %s148_s0 = smov [#allocation5]  }
   0xf   :  { %v24_v1 = vld [vmem:[#allocation2 + $0x2] sm:$0x3]  ;;  %v25_v2 = vld [vmem:[#allocation2 + $0x4] sm:$0x3]  ;;  %v26_v3 = vld [vmem:[#allocation2 + $0x6] sm:$0x3]  ;;  %v31_v4 = vmul.f32 %v23_v0, %v23_v0 }
  0x10   :  { %v32_v5 = vmul.f32 %v24_v1, %v24_v1  ;;  %v33_v6 = vmul.f32 %v25_v2, %v25_v2  ;;  %v27_v7 = vld [vmem:[#allocation2 + $0x8] sm:$0x3]  ;;  %v28_v8 = vld [vmem:[#allocation2 + $0xa] sm:$0x3]  ;;  %v34_v9 = vmul.f32 %v26_v3, %v26_v3  ;;  %v29_v10 = vld [vmem:[#allocation2 + $0xc] sm:$0x3] }
  0x11   :  { %v30_v11 = vld [vmem:[#allocation2 + $0xe] sm:$0x3]  ;;  %v35_v12 = vmul.f32 %v27_v7, %v27_v7  ;;  %v36_v13 = vmul.f32 %v28_v8, %v28_v8  ;;  %v40_v14 = vsel %vm39_vm0, %v31_v4, 0.0  ;;  %v37_v17 = vmul.f32 %v29_v10, %v29_v10  ;;  %s81_s13 = sshll.u32 %s148_s0, 4  ;;  %s82_s13 = int_to_ptr.vmem [resolvable:$true] %s81_s13 }
  0x12   :  { %v41_v15 = vsel %vm39_vm0, %v32_v5, 0.0  ;;  %v43_v16 = vsel %vm39_vm0, %v33_v6, 0.0  ;;  %v38_v19 = vmul.f32 %v30_v11, %v30_v11  ;;  %v45_v21 = vsel %vm39_vm0, %v34_v9, 0.0  ;;  %s121_s14 = scalar_lea.vmem %s82_s13, 256  ;;  %p126_p6 = scmp.lt.s32.totalorder %s82_s13, %s82_s13 }
  0x13   :  { %v42_v18 = vadd.f32 %v41_v15, %v40_v14  ;;  %v47_v20 = vsel %vm39_vm0, %v35_v12, 0.0  ;;  %v48_v22 = vsel %vm39_vm0, %v36_v13, 0.0  ;;  %v50_v23 = vsel %vm39_vm0, %v37_v17, 0.0  ;;  %p122_p5 = scmp.ne.s32.totalorder %s82_s13, %s121_s14  ;;  %p127_p7 = scmp.lt.s32.totalorder %s121_s14, %s121_s14 }
  0x14   :  { %v49_v25 = vadd.f32 %v48_v22, %v47_v20  ;;  %v52_v26 = vsel %vm39_vm0, %v38_v19, 0.0 }
  0x15   :  { %v44_v24 = vadd.f32 %v43_v16, %v42_v18  ;;  %p128_p8 = por %p127_p7, %p126_p6 }
  0x16   :  { %v51_v28 = vadd.f32 %v50_v23, %v49_v25 }
  0x17   :  { %v46_v27 = vadd.f32 %v45_v21, %v44_v24  ;;  %p129_p9 = pnand %p128_p8, %p122_p5 }
  0x18   :  { %v53_v30 = vadd.f32 %v52_v26, %v51_v28 }
  0x19   :  { %v54_v29 = vmul.f32 0.25, %v46_v27 }
  0x1a   :  { %v55_v32 = vmul.f32 0.25, %v53_v30 }
  0x1b   :  { %v56_v31 = vadd.f32 1e-08, %v54_v29 }
  0x1c   :  { %v57_v33 = vadd.f32 1e-08, %v55_v32 }
  0x1d   :  { %97 = vrsqrt.f32 %v56_v31 }
  0x1e   :  { %99 = vrsqrt.f32 %v57_v33 }
  0x2a   :  { %v98_v34 = vpop.eup %97 }
  0x2b   :  { %v60_v35 = vmul.f32 %v98_v34, %v23_v0  ;;  %v61_v36 = vmul.f32 %v98_v34, %v24_v1  ;;  %v62_v37 = vmul.f32 %v98_v34, %v25_v2  ;;  %v63_v38 = vmul.f32 %v98_v34, %v26_v3  ;;  %v100_v39 = vpop.eup %99 }
  0x2c   :  { %v64_v40 = vmul.f32 %v100_v39, %v27_v7  ;;  %v65_v41 = vmul.f32 %v100_v39, %v28_v8  ;;  %v66_v42 = vmul.f32 %v100_v39, %v29_v10  ;;  %v67_v43 = vmul.f32 %v100_v39, %v30_v11 }
  0x2d   :  { %68 = vst [vmem:[#allocation5] sm:$0x3] %v60_v35  ;;  %69 = vst [vmem:[#allocation5 + $0x2] sm:$0x3] %v61_v36 }
  0x2e   :  { %70 = vst [vmem:[#allocation5 + $0x4] sm:$0x3] %v62_v37  ;;  %71 = vst [vmem:[#allocation5 + $0x6] sm:$0x3] %v63_v38 }
  0x2f   :  { %72 = vst [vmem:[#allocation5 + $0x8] sm:$0x3] %v64_v40  ;;  %73 = vst [vmem:[#allocation5 + $0xa] sm:$0x3] %v65_v41 }
  0x30   :  { %74 = vst [vmem:[#allocation5 + $0xc] sm:$0x3] %v66_v42  ;;  %75 = vst [vmem:[#allocation5 + $0xe] sm:$0x3] %v67_v43 }
  0x31   :  { %132 = shalt.err (!%p129_p9)
}
  0x32   :  { %87 = dma.vmem_to_hbm [thread:$0]  %s82_s13, 256, %s180_s1, [#allocation4], %s146_s9, %s146_s9, %s147_s10  }
  0x33   :  { %143 = dma.done.wait [#allocation4], 256  }
  0x34   :  { %144 = vsyncadd [#allocation4], 4294967040 }
  0x35   :  { %91 = vsyncpa [#allocation3], 1 }
  0x36   :  { %92 = vsyncpa [#allocation4], 1 }

</bundles_post_ra>
